<compile_context>
chip_gen: v5e
topology: v5e:2x2
jax: 0.10.0
libtpu: 0.0.40
codegen_flags: <defaults>
</compile_context>

<pallas_src>
import numpy as np
import jax
import jax.numpy as jnp
from jax import lax
from jax.experimental import pallas as pl
from jax.experimental.pallas import tpu as pltpu

HIGHEST = jax.lax.Precision.HIGHEST  # only used for the XLA reference


# ------------------------------ Pallas kernel ------------------------------ #

def _policy_kernel(px_ref, w1_ref, w2_ref, f1_ref, vec_ref, o_ref):
    # px_ref : (1, S2*TB, 9*27+1) bf16  rows ordered (conv2-pos, batch);
    #          cols = (conv2-tap, conv1-chan, conv1-tap); last col == 1.0
    # w1_ref : (9*27+1, 9*16+1)   bf16  block-diag conv1 weight, bias in the
    #          last K row, last N col forwards the ones column
    # w2_ref : (9*16+1, 32+1)     f32   conv2 taps packed along K, bias row,
    #          ones-column forwarding in the last N col
    # f1_ref : (S2, 32+1, 128)    f32   torch Flatten folded in; fc1 bias rides
    #          on the ones column of the s == 0 slab
    # vec_ref: (2, 128)           f32   row 0 = fc2 weight row, row 1 = fc2_b/128
    # o_ref  : (1, 1, TB)         f32
    S2 = f1_ref.shape[0]
    TB = o_ref.shape[2]

    # conv1 (+bias) -> ReLU : ONE bf16 MXU matmul, f32 accumulate.
    h1 = jnp.dot(px_ref[0], w1_ref[...], preferred_element_type=jnp.float32)
    h1 = jnp.maximum(h1, 0.0)                       # (S2*TB, 145); col 144 == 1

    # conv2 (+bias) -> ReLU : ONE matmul (taps live in the K axis).
    a2 = jnp.dot(h1, w2_ref[...], preferred_element_type=jnp.float32)
    a2 = jnp.maximum(a2, 0.0)                       # (S2*TB, 33); col 32 == 1

    # fc1 (+bias) -> ReLU : S2 accumulated matmuls over contiguous
    # 8-sublane-aligned row slices (TB % 8 == 0 by construction).
    hid = jnp.dot(a2[0:TB, :], f1_ref[0], preferred_element_type=jnp.float32)
    for s in range(1, S2):
        hid = hid + jnp.dot(a2[s * TB:(s + 1) * TB, :], f1_ref[s],
                            preferred_element_type=jnp.float32)
    hid = jnp.maximum(hid, 0.0)                     # (TB, 128)

    # fc2 : VPU multiply + lane reduction (an N=1 MXU push is pure overhead);
    # fc2 bias arrives as fc2_b/128 added to every lane before the reduce.
    prod = hid * vec_ref[0:1, :] + vec_ref[1:2, :]
    o_ref[0, 0] = jnp.sum(prod, axis=1)


# ------------------------------- host glue --------------------------------- #

def _round_up(x, m):
    return ((x + m - 1) // m) * m


def _patch_index(cin, h, w, k, s):
    """(S2, 9*cin*9 + 1) gather table into the flattened per-sample image.

    Row s2 = conv2 output position; column t*F + (c*9 + ky1*3 + kx1) is the
    flat image offset read by conv1 feeding conv2 tap t = (ky2, kx2).  The last
    column points at an appended constant 1.0 (drives the in-matmul biases).
    """
    h1, w1 = (h - k) // s + 1, (w - k) // s + 1
    h2, w2 = (h1 - k) // s + 1, (w1 - k) // s + 1
    f = cin * k * k
    idx = np.empty((h2 * w2, k * k * f + 1), np.int32)
    for oy in range(h2):
        for ox in range(w2):
            s2 = oy * w2 + ox
            for ky2 in range(k):
                for kx2 in range(k):
                    t = ky2 * k + kx2
                    y1, x1 = s * oy + ky2, s * ox + kx2
                    for c in range(cin):
                        for ky1 in range(k):
                            for kx1 in range(k):
                                p = c * k * k + ky1 * k + kx1
                                idx[s2, t * f + p] = (c * h * w
                                                      + (s * y1 + ky1) * w
                                                      + (s * x1 + kx1))
            idx[s2, k * k * f] = cin * h * w        # the appended 1.0
    return idx, h2 * w2


def _fold_params(params, S2):
    """Fold SimplePolicy weights into MXU-friendly packed layouts (host, once)."""
    C1 = params["b1"].shape[0]                      # 16
    C2 = params["b2"].shape[0]                      # 32
    Hd = params["fc1_b"].shape[0]                   # 128
    _, Cin, k, _ = params["w1"].shape
    n_taps = k * k
    F = Cin * k * k

    # conv1: block-diagonal over conv2 taps; bias in the extra K row; last N
    # column forwards the ones column downstream.
    w1_flat = params["w1"].reshape(C1, F).T                              # (27, 16)
    w1bd = jnp.zeros((n_taps * F + 1, n_taps * C1 + 1), jnp.float32)
    for t in range(n_taps):
        w1bd = w1bd.at[t * F:(t + 1) * F, t * C1:(t + 1) * C1].set(w1_flat)
    w1bd = w1bd.at[n_taps * F, :n_taps * C1].set(jnp.tile(params["b1"], n_taps))
    w1bd = w1bd.at[n_taps * F, n_taps * C1].set(1.0)

    # conv2: taps packed along K; bias row; ones-column forwarding.
    w2t = jnp.transpose(params["w2"], (2, 3, 1, 0)).reshape(n_taps * C1, C2)
    w2p = jnp.zeros((n_taps * C1 + 1, C2 + 1), jnp.float32)
    w2p = w2p.at[:n_taps * C1, :C2].set(w2t)
    w2p = w2p.at[n_taps * C1, :C2].set(params["b2"])
    w2p = w2p.at[n_taps * C1, C2].set(1.0)

    # fc1: torch channel-major Flatten (f = c*S2 + s) folded into the layout;
    # fc1 bias rides on the ones column of slab s == 0.
    f1 = jnp.transpose(params["fc1_w"].reshape(Hd, C2, S2), (2, 1, 0))
    f1p = jnp.zeros((S2, C2 + 1, Hd), jnp.float32)
    f1p = f1p.at[:, :C2, :].set(f1)
    f1p = f1p.at[0, C2, :].set(params["fc1_b"])

    # fc2: weight row + bias/Hd (the in-kernel lane reduce restores fc2_b).
    vec = jnp.stack([params["fc2_w"][0],
                     jnp.full((Hd,), params["fc2_b"][0] / Hd)], axis=0)

    return w1bd.astype(jnp.bfloat16), w2p, f1p, vec


def simple_policy_forward(images, params, batch_tile=128):
    """Pallas TPU implementation of SimplePolicy.forward (use_qpos=False)."""
    B, Cin, H, W = images.shape
    k, s = 3, 2
    C1 = params["b1"].shape[0]
    C2 = params["b2"].shape[0]
    Hd = params["fc1_b"].shape[0]
    idx, S2 = _patch_index(Cin, H, W, k, s)
    K1 = idx.shape[1]                               # 9*Cin*9 + 1
    N1 = k * k * C1 + 1

    # Batch tiling: TB a multiple of 8 (keeps in-kernel slices tile-aligned);
    # prefer >= 2 grid steps when it costs no extra padding so the "parallel"
    # axis can shard across both v7x TensorCores.
    TB = _round_up(min(batch_tile, _round_up(B, 8)), 8)
    if _round_up(B, 8) >= 16 and -(-B // TB) < 2:
        TB = _round_up(-(-B // 2), 8)
    ntiles = -(-B // TB)
    B_pad = ntiles * TB
    R = S2 * TB

    # Patch extraction: one gather from the flattened per-sample image (with a
    # trailing 1.0 appended for the in-matmul biases), then a single transpose
    # into (tile, conv2-pos, batch, feature) order.  Cast to bf16 before the
    # transpose so the relayout moves half the bytes.
    img = images.reshape(B, Cin * H * W).astype(jnp.float32)
    if B_pad != B:
        img = jnp.pad(img, ((0, B_pad - B), (0, 0)))
    img = jnp.concatenate([img, jnp.ones((B_pad, 1), jnp.float32)], axis=1)
    g = jnp.take(img, jnp.asarray(idx.reshape(-1)), axis=1).astype(jnp.bfloat16)
    px = (g.reshape(ntiles, TB, S2, K1)
            .transpose(0, 2, 1, 3)
            .reshape(ntiles, R, K1))

    w1bd, w2p, f1p, vec = _fold_params(params, S2)

    out = pl.pallas_call(
        _policy_kernel,
        grid=(ntiles,),
        in_specs=[
            pl.BlockSpec((1, R, K1), lambda i: (i, 0, 0)),
            pl.BlockSpec((K1, N1), lambda i: (0, 0)),
            pl.BlockSpec((N1, C2 + 1), lambda i: (0, 0)),
            pl.BlockSpec((S2, C2 + 1, Hd), lambda i: (0, 0, 0)),
            pl.BlockSpec((2, Hd), lambda i: (0, 0)),
        ],
        out_specs=pl.BlockSpec((1, 1, TB), lambda i: (i, 0, 0)),
        out_shape=jax.ShapeDtypeStruct((ntiles, 1, TB), jnp.float32),
        compiler_params=pltpu.CompilerParams(
            dimension_semantics=("parallel",),
            vmem_limit_bytes=32 * 1024 * 1024),
    )(px, w1bd, w2p, f1p, vec)

    return out.reshape(B_pad, 1)[:B]


# ------------------------ reference & initialization ----------------------- #

def reference_forward(images, params):
    dn = ("NCHW", "OIHW", "NCHW")
    h = lax.conv_general_dilated(images, params["w1"], (2, 2), "VALID",
                                 dimension_numbers=dn, precision=HIGHEST)
    h = jax.nn.relu(h + params["b1"][None, :, None, None])
    h = lax.conv_general_dilated(h, params["w2"], (2, 2), "VALID",
                                 dimension_numbers=dn, precision=HIGHEST)
    h = jax.nn.relu(h + params["b2"][None, :, None, None])
    flat = h.reshape(h.shape[0], -1)                      # channel-major flatten
    hid = jax.nn.relu(jnp.dot(flat, params["fc1_w"].T, precision=HIGHEST)
                      + params["fc1_b"])
    return jnp.dot(hid, params["fc2_w"].T, precision=HIGHEST) + params["fc2_b"]


def init_params(key, image_size, hidden=128):
    k, s = 3, 2
    size1 = (image_size - k) // s + 1
    size2 = (size1 - k) // s + 1
    flat = 32 * size2 * size2
    ks = jax.random.split(key, 8)
    scale = 0.1
    return {
        "w1": scale * jax.random.normal(ks[0], (16, 3, 3, 3), jnp.float32),
        "b1": scale * jax.random.normal(ks[1], (16,), jnp.float32),
        "w2": scale * jax.random.normal(ks[2], (32, 16, 3, 3), jnp.float32),
        "b2": scale * jax.random.normal(ks[3], (32,), jnp.float32),
        "fc1_w": scale * jax.random.normal(ks[4], (hidden, flat), jnp.float32),
        "fc1_b": scale * jax.random.normal(ks[5], (hidden,), jnp.float32),
        "fc2_w": scale * jax.random.normal(ks[6], (1, hidden), jnp.float32),
        "fc2_b": scale * jax.random.normal(ks[7], (1,), jnp.float32),
    }


if __name__ == "__main__":
    key = jax.random.PRNGKey(0)
    k_img, k_par = jax.random.split(key)

    B, IMG = 2, 16                      # small image_size consistent w/ module
    images = jax.random.uniform(k_img, (B, 3, IMG, IMG), dtype=jnp.float32)
    params = init_params(k_par, IMG)

    out = jax.block_until_ready(simple_policy_forward(images, params))
    assert out.shape == (B, 1), out.shape

    ref = reference_forward(images, params)
    max_err = float(jnp.max(jnp.abs(out - ref)))
    if not bool(jnp.allclose(out, ref, atol=5e-3, rtol=5e-3)):
        raise AssertionError(f"Pallas output mismatch vs reference, "
                             f"max abs err = {max_err}")
    print("KERNEL_OK")
</pallas_src>

<mosaic_0001>
module attributes {stable_mosaic.version = 11 : i64} {
  func.func @_policy_kernel(%arg0: i32, %arg1: memref<1x72x244xbf16, #tpu.memory_space<vmem>>, %arg2: memref<244x145xbf16, #tpu.memory_space<vmem>>, %arg3: memref<145x33xf32, #tpu.memory_space<vmem>>, %arg4: memref<9x33x128xf32, #tpu.memory_space<vmem>>, %arg5: memref<2x128xf32, #tpu.memory_space<vmem>>, %arg6: memref<1x1x8xf32, #tpu.memory_space<vmem>>) attributes {dimension_semantics = [#tpu.dimension_semantics<parallel>], iteration_bounds = array<i64: 1>, scalar_prefetch = 0 : i64, scratch_operands = 0 : i64, tpu.core_type = #tpu.core_type<tc>, window_params = [{transform_indices = @transform_0, window_bounds = array<i64: 1, 72, 244>}, {pipeline_mode = #tpu.pipeline_mode<synchronous>, transform_indices = @transform_1, window_bounds = array<i64: 244, 145>}, {pipeline_mode = #tpu.pipeline_mode<synchronous>, transform_indices = @transform_2, window_bounds = array<i64: 145, 33>}, {pipeline_mode = #tpu.pipeline_mode<synchronous>, transform_indices = @transform_3, window_bounds = array<i64: 9, 33, 128>}, {pipeline_mode = #tpu.pipeline_mode<synchronous>, transform_indices = @transform_4, window_bounds = array<i64: 2, 128>}, {transform_indices = @transform_5, window_bounds = array<i64: 1, 1, 8>}]} {
    %c0 = arith.constant 0 : index
    %c0_0 = arith.constant 0 : index
    %c0_1 = arith.constant 0 : index
    %0 = vector.load %arg1[%c0, %c0_0, %c0_1] : memref<1x72x244xbf16, #tpu.memory_space<vmem>>, vector<1x72x244xbf16>
    %1 = vector.shape_cast %0 : vector<1x72x244xbf16> to vector<72x244xbf16>
    %c0_2 = arith.constant 0 : index
    %c0_3 = arith.constant 0 : index
    %2 = vector.load %arg2[%c0_2, %c0_3] : memref<244x145xbf16, #tpu.memory_space<vmem>>, vector<244x145xbf16>
    %cst = arith.constant dense<0.000000e+00> : vector<72x145xf32>
    %3 = tpu.matmul %1, %2, %cst {dimension_numbers = #tpu.dot_dimension_numbers<[1], [0], [0], [1], [0, 0, 1, 1], [], []>} : vector<72x244xbf16>, vector<244x145xbf16>, vector<72x145xf32> -> vector<72x145xf32>
    %cst_4 = arith.constant 0.000000e+00 : f32
    %4 = vector.broadcast %cst_4 : f32 to vector<72x145xf32>
    %5 = arith.maximumf %3, %4 : vector<72x145xf32>
    %c0_5 = arith.constant 0 : index
    %c0_6 = arith.constant 0 : index
    %6 = vector.load %arg3[%c0_5, %c0_6] : memref<145x33xf32, #tpu.memory_space<vmem>>, vector<145x33xf32>
    %cst_7 = arith.constant dense<0.000000e+00> : vector<72x33xf32>
    %7 = tpu.matmul %5, %6, %cst_7 {dimension_numbers = #tpu.dot_dimension_numbers<[1], [0], [0], [1], [0, 0, 1, 1], [], []>} : vector<72x145xf32>, vector<145x33xf32>, vector<72x33xf32> -> vector<72x33xf32>
    %cst_8 = arith.constant 0.000000e+00 : f32
    %8 = vector.broadcast %cst_8 : f32 to vector<72x33xf32>
    %9 = arith.maximumf %7, %8 : vector<72x33xf32>
    %10 = vector.extract_strided_slice %9 {offsets = [0, 0], sizes = [8, 33], strides = [1, 1]} : vector<72x33xf32> to vector<8x33xf32>
    %c0_9 = arith.constant 0 : index
    %c0_10 = arith.constant 0 : index
    %c0_11 = arith.constant 0 : index
    %11 = vector.load %arg4[%c0_9, %c0_10, %c0_11] : memref<9x33x128xf32, #tpu.memory_space<vmem>>, vector<1x33x128xf32>
    %12 = vector.shape_cast %11 : vector<1x33x128xf32> to vector<33x128xf32>
    %cst_12 = arith.constant dense<0.000000e+00> : vector<8x128xf32>
    %13 = tpu.matmul %10, %12, %cst_12 {dimension_numbers = #tpu.dot_dimension_numbers<[1], [0], [0], [1], [0, 0, 1, 1], [], []>} : vector<8x33xf32>, vector<33x128xf32>, vector<8x128xf32> -> vector<8x128xf32>
    %14 = vector.extract_strided_slice %9 {offsets = [8, 0], sizes = [8, 33], strides = [1, 1]} : vector<72x33xf32> to vector<8x33xf32>
    %c1 = arith.constant 1 : index
    %c0_13 = arith.constant 0 : index
    %c0_14 = arith.constant 0 : index
    %15 = vector.load %arg4[%c1, %c0_13, %c0_14] : memref<9x33x128xf32, #tpu.memory_space<vmem>>, vector<1x33x128xf32>
    %16 = vector.shape_cast %15 : vector<1x33x128xf32> to vector<33x128xf32>
    %cst_15 = arith.constant dense<0.000000e+00> : vector<8x128xf32>
    %17 = tpu.matmul %14, %16, %cst_15 {dimension_numbers = #tpu.dot_dimension_numbers<[1], [0], [0], [1], [0, 0, 1, 1], [], []>} : vector<8x33xf32>, vector<33x128xf32>, vector<8x128xf32> -> vector<8x128xf32>
    %18 = arith.addf %13, %17 : vector<8x128xf32>
    %19 = vector.extract_strided_slice %9 {offsets = [16, 0], sizes = [8, 33], strides = [1, 1]} : vector<72x33xf32> to vector<8x33xf32>
    %c2 = arith.constant 2 : index
    %c0_16 = arith.constant 0 : index
    %c0_17 = arith.constant 0 : index
    %20 = vector.load %arg4[%c2, %c0_16, %c0_17] : memref<9x33x128xf32, #tpu.memory_space<vmem>>, vector<1x33x128xf32>
    %21 = vector.shape_cast %20 : vector<1x33x128xf32> to vector<33x128xf32>
    %cst_18 = arith.constant dense<0.000000e+00> : vector<8x128xf32>
    %22 = tpu.matmul %19, %21, %cst_18 {dimension_numbers = #tpu.dot_dimension_numbers<[1], [0], [0], [1], [0, 0, 1, 1], [], []>} : vector<8x33xf32>, vector<33x128xf32>, vector<8x128xf32> -> vector<8x128xf32>
    %23 = arith.addf %18, %22 : vector<8x128xf32>
    %24 = vector.extract_strided_slice %9 {offsets = [24, 0], sizes = [8, 33], strides = [1, 1]} : vector<72x33xf32> to vector<8x33xf32>
    %c3 = arith.constant 3 : index
    %c0_19 = arith.constant 0 : index
    %c0_20 = arith.constant 0 : index
    %25 = vector.load %arg4[%c3, %c0_19, %c0_20] : memref<9x33x128xf32, #tpu.memory_space<vmem>>, vector<1x33x128xf32>
    %26 = vector.shape_cast %25 : vector<1x33x128xf32> to vector<33x128xf32>
    %cst_21 = arith.constant dense<0.000000e+00> : vector<8x128xf32>
    %27 = tpu.matmul %24, %26, %cst_21 {dimension_numbers = #tpu.dot_dimension_numbers<[1], [0], [0], [1], [0, 0, 1, 1], [], []>} : vector<8x33xf32>, vector<33x128xf32>, vector<8x128xf32> -> vector<8x128xf32>
    %28 = arith.addf %23, %27 : vector<8x128xf32>
    %29 = vector.extract_strided_slice %9 {offsets = [32, 0], sizes = [8, 33], strides = [1, 1]} : vector<72x33xf32> to vector<8x33xf32>
    %c4 = arith.constant 4 : index
    %c0_22 = arith.constant 0 : index
    %c0_23 = arith.constant 0 : index
    %30 = vector.load %arg4[%c4, %c0_22, %c0_23] : memref<9x33x128xf32, #tpu.memory_space<vmem>>, vector<1x33x128xf32>
    %31 = vector.shape_cast %30 : vector<1x33x128xf32> to vector<33x128xf32>
    %cst_24 = arith.constant dense<0.000000e+00> : vector<8x128xf32>
    %32 = tpu.matmul %29, %31, %cst_24 {dimension_numbers = #tpu.dot_dimension_numbers<[1], [0], [0], [1], [0, 0, 1, 1], [], []>} : vector<8x33xf32>, vector<33x128xf32>, vector<8x128xf32> -> vector<8x128xf32>
    %33 = arith.addf %28, %32 : vector<8x128xf32>
    %34 = vector.extract_strided_slice %9 {offsets = [40, 0], sizes = [8, 33], strides = [1, 1]} : vector<72x33xf32> to vector<8x33xf32>
    %c5 = arith.constant 5 : index
    %c0_25 = arith.constant 0 : index
    %c0_26 = arith.constant 0 : index
    %35 = vector.load %arg4[%c5, %c0_25, %c0_26] : memref<9x33x128xf32, #tpu.memory_space<vmem>>, vector<1x33x128xf32>
    %36 = vector.shape_cast %35 : vector<1x33x128xf32> to vector<33x128xf32>
    %cst_27 = arith.constant dense<0.000000e+00> : vector<8x128xf32>
    %37 = tpu.matmul %34, %36, %cst_27 {dimension_numbers = #tpu.dot_dimension_numbers<[1], [0], [0], [1], [0, 0, 1, 1], [], []>} : vector<8x33xf32>, vector<33x128xf32>, vector<8x128xf32> -> vector<8x128xf32>
    %38 = arith.addf %33, %37 : vector<8x128xf32>
    %39 = vector.extract_strided_slice %9 {offsets = [48, 0], sizes = [8, 33], strides = [1, 1]} : vector<72x33xf32> to vector<8x33xf32>
    %c6 = arith.constant 6 : index
    %c0_28 = arith.constant 0 : index
    %c0_29 = arith.constant 0 : index
    %40 = vector.load %arg4[%c6, %c0_28, %c0_29] : memref<9x33x128xf32, #tpu.memory_space<vmem>>, vector<1x33x128xf32>
    %41 = vector.shape_cast %40 : vector<1x33x128xf32> to vector<33x128xf32>
    %cst_30 = arith.constant dense<0.000000e+00> : vector<8x128xf32>
    %42 = tpu.matmul %39, %41, %cst_30 {dimension_numbers = #tpu.dot_dimension_numbers<[1], [0], [0], [1], [0, 0, 1, 1], [], []>} : vector<8x33xf32>, vector<33x128xf32>, vector<8x128xf32> -> vector<8x128xf32>
    %43 = arith.addf %38, %42 : vector<8x128xf32>
    %44 = vector.extract_strided_slice %9 {offsets = [56, 0], sizes = [8, 33], strides = [1, 1]} : vector<72x33xf32> to vector<8x33xf32>
    %c7 = arith.constant 7 : index
    %c0_31 = arith.constant 0 : index
    %c0_32 = arith.constant 0 : index
    %45 = vector.load %arg4[%c7, %c0_31, %c0_32] : memref<9x33x128xf32, #tpu.memory_space<vmem>>, vector<1x33x128xf32>
    %46 = vector.shape_cast %45 : vector<1x33x128xf32> to vector<33x128xf32>
    %cst_33 = arith.constant dense<0.000000e+00> : vector<8x128xf32>
    %47 = tpu.matmul %44, %46, %cst_33 {dimension_numbers = #tpu.dot_dimension_numbers<[1], [0], [0], [1], [0, 0, 1, 1], [], []>} : vector<8x33xf32>, vector<33x128xf32>, vector<8x128xf32> -> vector<8x128xf32>
    %48 = arith.addf %43, %47 : vector<8x128xf32>
    %49 = vector.extract_strided_slice %9 {offsets = [64, 0], sizes = [8, 33], strides = [1, 1]} : vector<72x33xf32> to vector<8x33xf32>
    %c8 = arith.constant 8 : index
    %c0_34 = arith.constant 0 : index
    %c0_35 = arith.constant 0 : index
    %50 = vector.load %arg4[%c8, %c0_34, %c0_35] : memref<9x33x128xf32, #tpu.memory_space<vmem>>, vector<1x33x128xf32>
    %51 = vector.shape_cast %50 : vector<1x33x128xf32> to vector<33x128xf32>
    %cst_36 = arith.constant dense<0.000000e+00> : vector<8x128xf32>
    %52 = tpu.matmul %49, %51, %cst_36 {dimension_numbers = #tpu.dot_dimension_numbers<[1], [0], [0], [1], [0, 0, 1, 1], [], []>} : vector<8x33xf32>, vector<33x128xf32>, vector<8x128xf32> -> vector<8x128xf32>
    %53 = arith.addf %48, %52 : vector<8x128xf32>
    %cst_37 = arith.constant 0.000000e+00 : f32
    %54 = vector.broadcast %cst_37 : f32 to vector<8x128xf32>
    %55 = arith.maximumf %53, %54 : vector<8x128xf32>
    %c0_38 = arith.constant 0 : index
    %c0_39 = arith.constant 0 : index
    %56 = vector.load %arg5[%c0_38, %c0_39] : memref<2x128xf32, #tpu.memory_space<vmem>>, vector<1x128xf32>
    %57 = vector.broadcast %56 : vector<1x128xf32> to vector<8x128xf32>
    %58 = arith.mulf %55, %57 : vector<8x128xf32>
    %c1_40 = arith.constant 1 : index
    %c0_41 = arith.constant 0 : index
    %59 = vector.load %arg5[%c1_40, %c0_41] : memref<2x128xf32, #tpu.memory_space<vmem>>, vector<1x128xf32>
    %60 = vector.broadcast %59 : vector<1x128xf32> to vector<8x128xf32>
    %61 = arith.addf %58, %60 : vector<8x128xf32>
    %cst_42 = arith.constant dense<0.000000e+00> : vector<8xf32>
    %62 = vector.multi_reduction <add>, %61, %cst_42 [1] : vector<8x128xf32> to vector<8xf32>
    %c0_43 = arith.constant 0 : index
    %c0_44 = arith.constant 0 : index
    %c0_45 = arith.constant 0 : index
    %63 = vector.load %arg6[%c0_43, %c0_44, %c0_45] : memref<1x1x8xf32, #tpu.memory_space<vmem>>, vector<1x1x8xf32>
    %64 = vector.shape_cast %63 : vector<1x1x8xf32> to vector<8xf32>
    %65 = vector.shape_cast %62 : vector<8xf32> to vector<1x1x8xf32>
    tpu.vector_store %arg6[%c0_43, %c0_44, %c0_45], %65 {strides = array<i32>} : memref<1x1x8xf32, #tpu.memory_space<vmem>>, vector<1x1x8xf32>,
    return
  }
  func.func @transform_0(%arg0: i32) -> (i32, i32, i32) {
    %c0_i32 = arith.constant 0 : i32
    %c0_i32_0 = arith.constant 0 : i32
    %c0_i32_1 = arith.constant 0 : i32
    return %arg0, %c0_i32, %c0_i32_0 : i32, i32, i32
  }
  func.func @transform_1(%arg0: i32) -> (i32, i32) {
    %c0_i32 = arith.constant 0 : i32
    %c0_i32_0 = arith.constant 0 : i32
    %c0_i32_1 = arith.constant 0 : i32
    return %c0_i32, %c0_i32_0 : i32, i32
  }
  func.func @transform_2(%arg0: i32) -> (i32, i32) {
    %c0_i32 = arith.constant 0 : i32
    %c0_i32_0 = arith.constant 0 : i32
    %c0_i32_1 = arith.constant 0 : i32
    return %c0_i32, %c0_i32_0 : i32, i32
  }
  func.func @transform_3(%arg0: i32) -> (i32, i32, i32) {
    %c0_i32 = arith.constant 0 : i32
    %c0_i32_0 = arith.constant 0 : i32
    %c0_i32_1 = arith.constant 0 : i32
    %c0_i32_2 = arith.constant 0 : i32
    return %c0_i32, %c0_i32_0, %c0_i32_1 : i32, i32, i32
  }
  func.func @transform_4(%arg0: i32) -> (i32, i32) {
    %c0_i32 = arith.constant 0 : i32
    %c0_i32_0 = arith.constant 0 : i32
    %c0_i32_1 = arith.constant 0 : i32
    return %c0_i32, %c0_i32_0 : i32, i32
  }
  func.func @transform_5(%arg0: i32) -> (i32, i32, i32) {
    %c0_i32 = arith.constant 0 : i32
    %c0_i32_0 = arith.constant 0 : i32
    %c0_i32_1 = arith.constant 0 : i32
    return %arg0, %c0_i32, %c0_i32_0 : i32, i32, i32
  }
}

</mosaic_0001>

<bundles_post_ra>
// kernel: tpu_custom_call.1
= control target key start
LH: loop header
LB: loop body
LE: loop exit
PB: predicated region body
PF: predicated region fallthrough
CT: control target
= control target key end

     0   :  { %vm274_vm0 = vcmask 1041408   ;;  %s1729_s0 = inlined_call_operand.vmem [shape: bf16[1,72,244], index: 0, kind: input, shape index: {}]   ;;  %s1730_s1 = inlined_call_operand.vmem [shape: bf16[244,145], index: 1, kind: input, shape index: {}]   ;;  %s1731_s2 = inlined_call_operand.vmem [shape: f32[145,33], index: 2, kind: input, shape index: {}]   ;;  %s1732_s3 = inlined_call_operand.vmem [shape: f32[9,33,128], index: 3, kind: input, shape index: {}]   ;;  %s1733_s4 = inlined_call_operand.vmem [shape: f32[2,128], index: 4, kind: input, shape index: {}]   ;;  %s1734_s5 = inlined_call_operand.hbm [shape: f32[1,1,8], index: 5, kind: output, shape index: {}]  }
   0x1   :  { %v1158_v0 = vld [vmem:[%s1730_s1 + $0x74] sm:$0xf]  ;;  %v998_v1 = vld [vmem:[%s1730_s1 + $0x78] sm:$0xf0]  ;;  %v996_v2 = vld [vmem:[%s1730_s1 + $0x70] sm:$0xf] }
   0x2   :  { %v1001_v3 = vor.u32 %v1158_v0, %v998_v1  ;;  %v1159_v4 = vld [vmem:[%s1730_s1 + $0x74] sm:$0xf0]  ;;  %v60_v5 = vld [vmem:[%s1730_s1 + $0xf0] sm:$0x33]  ;;  %v1156_v9 = vld [vmem:[%s1730_s1 + $0x64] sm:$0xf] }
   0x3   :  { %v997_v6 = vor.u32 %v1159_v4, %v996_v2  ;;  %v194_v7 = vunpack.c.l.b16 %v60_v5  ;;  %v195_v8 = vunpack.c.h.b16 %v60_v5  ;;  %v990_v10 = vld [vmem:[%s1730_s1 + $0x68] sm:$0xf0]  ;;  %v988_v11 = vld [vmem:[%s1730_s1 + $0x60] sm:$0xf]  ;;  %v1157_v12 = vld [vmem:[%s1730_s1 + $0x64] sm:$0xf0] }
   0x4   :  { %347 = vmatpush.bf16.msra.mxu2 %v1001_v3  ;;  %v1052_v13 = vld [vmem:[%s1730_s1 + $0xe0] sm:$0xf]  ;;  %v1173_v14 = vld [vmem:[%s1730_s1 + $0xe4] sm:$0xf0]  ;;  %v993_v17 = vor.u32 %v1156_v9, %v990_v10  ;;  %v989_v18 = vor.u32 %v1157_v12, %v988_v11  ;;  %v1172_v19 = vld [vmem:[%s1730_s1 + $0xe4] sm:$0xf] }
   0x5   :  { %281 = vmatpush.bf16.msra.mxu0 %v997_v6  ;;  %v226_v15 = vpack.c.b16 %v194_v7, %v194_v7  ;;  %v227_v16 = vpack.c.b16 %v195_v8, %v195_v8  ;;  %v1054_v20 = vld [vmem:[%s1730_s1 + $0xe8] sm:$0xf0]  ;;  %v1154_v21 = vld [vmem:[%s1730_s1 + $0x54] sm:$0xf]  ;;  %v982_v22 = vld [vmem:[%s1730_s1 + $0x58] sm:$0xf0]  ;;  %v1053_v27 = vor.u32 %v1173_v14, %v1052_v13 }
   0x6   :  { %v980_v23 = vld [vmem:[%s1730_s1 + $0x50] sm:$0xf]  ;;  %v1155_v24 = vld [vmem:[%s1730_s1 + $0x54] sm:$0xf0]  ;;  %v1057_v28 = vor.u32 %v1172_v19, %v1054_v20  ;;  %v985_v31 = vor.u32 %v1154_v21, %v982_v22  ;;  %v1170_v33 = vld [vmem:[%s1730_s1 + $0xd4] sm:$0xf] }
   0x7   :  { %v276_v25 = vsel %vm274_vm0, %v226_v15, 0  ;;  %v279_v26 = vsel %vm274_vm0, %v227_v16, 0  ;;  %v1044_v29 = vld [vmem:[%s1730_s1 + $0xd0] sm:$0xf]  ;;  %v1171_v30 = vld [vmem:[%s1730_s1 + $0xd4] sm:$0xf0]  ;;  %v981_v32 = vor.u32 %v1155_v24, %v980_v23 }
   0x8   :  { %314 = vmatpush.bf16.msra.mxu1 %v276_v25  ;;  %380 = vmatpush.bf16.msra.mxu3 %v279_v26  ;;  %v1046_v34 = vld [vmem:[%s1730_s1 + $0xd8] sm:$0xf0]  ;;  %v1152_v35 = vld [vmem:[%s1730_s1 + $0x44] sm:$0xf]  ;;  %v974_v36 = vld [vmem:[%s1730_s1 + $0x48] sm:$0xf0]  ;;  %v1045_v39 = vor.u32 %v1171_v30, %v1044_v29 }
   0x9   :  { %348 = vmatpush.bf16.msra.mxu2 %v993_v17  ;;  %282 = vmatpush.bf16.msra.mxu0 %v989_v18  ;;  %v972_v37 = vld [vmem:[%s1730_s1 + $0x40] sm:$0xf]  ;;  %v1153_v38 = vld [vmem:[%s1730_s1 + $0x44] sm:$0xf0]  ;;  %v1049_v40 = vor.u32 %v1170_v33, %v1046_v34  ;;  %v977_v43 = vor.u32 %v1152_v35, %v974_v36  ;;  %v1168_v45 = vld [vmem:[%s1730_s1 + $0xc4] sm:$0xf] }
   0xa   :  { %v1036_v41 = vld [vmem:[%s1730_s1 + $0xc0] sm:$0xf]  ;;  %v1169_v42 = vld [vmem:[%s1730_s1 + $0xc4] sm:$0xf0]  ;;  %v973_v44 = vor.u32 %v1153_v38, %v972_v37  ;;  %v1038_v46 = vld [vmem:[%s1730_s1 + $0xc8] sm:$0xf0] }
   0xb   :  { %v1150_v47 = vld [vmem:[%s1730_s1 + $0x34] sm:$0xf]  ;;  %v966_v48 = vld [vmem:[%s1730_s1 + $0x38] sm:$0xf0]  ;;  %v964_v49 = vld [vmem:[%s1730_s1 + $0x30] sm:$0xf]  ;;  %v1037_v51 = vor.u32 %v1169_v42, %v1036_v41  ;;  %v1041_v52 = vor.u32 %v1168_v45, %v1038_v46 }
   0xc   :  { %315 = vmatpush.bf16.msra.mxu1 %v1053_v27  ;;  %381 = vmatpush.bf16.msra.mxu3 %v1057_v28  ;;  %v1151_v50 = vld [vmem:[%s1730_s1 + $0x34] sm:$0xf0]  ;;  %v1028_v53 = vld [vmem:[%s1730_s1 + $0xb0] sm:$0xf]  ;;  %v969_v55 = vor.u32 %v1150_v47, %v966_v48  ;;  %v1166_v57 = vld [vmem:[%s1730_s1 + $0xb4] sm:$0xf] }
   0xd   :  { %349 = vmatpush.bf16.msra.mxu2 %v985_v31  ;;  %283 = vmatpush.bf16.msra.mxu0 %v981_v32  ;;  %v1167_v54 = vld [vmem:[%s1730_s1 + $0xb4] sm:$0xf0]  ;;  %v965_v56 = vor.u32 %v1151_v50, %v964_v49  ;;  %v1030_v58 = vld [vmem:[%s1730_s1 + $0xb8] sm:$0xf0]  ;;  %v1148_v59 = vld [vmem:[%s1730_s1 + $0x24] sm:$0xf] }
   0xe   :  { %v958_v60 = vld [vmem:[%s1730_s1 + $0x28] sm:$0xf0]  ;;  %v956_v61 = vld [vmem:[%s1730_s1 + $0x20] sm:$0xf]  ;;  %v1149_v62 = vld [vmem:[%s1730_s1 + $0x24] sm:$0xf0]  ;;  %v1029_v63 = vor.u32 %v1167_v54, %v1028_v53  ;;  %v1033_v0 = vor.u32 %v1166_v57, %v1030_v58 }
   0xf   :  { %v1020_v1 = vld [vmem:[%s1730_s1 + $0xa0] sm:$0xf]  ;;  %v1165_v2 = vld [vmem:[%s1730_s1 + $0xa4] sm:$0xf0]  ;;  %v961_v3 = vor.u32 %v1148_v59, %v958_v60  ;;  %v957_v4 = vor.u32 %v1149_v62, %v956_v61  ;;  %v1164_v5 = vld [vmem:[%s1730_s1 + $0xa4] sm:$0xf] }
  0x10   :  { %316 = vmatpush.bf16.msra.mxu1 %v1045_v39  ;;  %382 = vmatpush.bf16.msra.mxu3 %v1049_v40  ;;  %v1022_v6 = vld [vmem:[%s1730_s1 + $0xa8] sm:$0xf0]  ;;  %v1146_v7 = vld [vmem:[%s1730_s1 + $0x14] sm:$0xf]  ;;  %v950_v8 = vld [vmem:[%s1730_s1 + $0x18] sm:$0xf0]  ;;  %v1021_v13 = vor.u32 %v1165_v2, %v1020_v1 }
  0x11   :  { %350 = vmatpush.bf16.msra.mxu2 %v977_v43  ;;  %284 = vmatpush.bf16.msra.mxu0 %v973_v44  ;;  %v948_v9 = vld [vmem:[%s1730_s1 + $0x10] sm:$0xf]  ;;  %v1147_v10 = vld [vmem:[%s1730_s1 + $0x14] sm:$0xf0]  ;;  %v1025_v14 = vor.u32 %v1164_v5, %v1022_v6  ;;  %v1162_v15 = vld [vmem:[%s1730_s1 + $0x94] sm:$0xf]  ;;  %v953_v18 = vor.u32 %v1146_v7, %v950_v8 }
  0x12   :  { %v1012_v11 = vld [vmem:[%s1730_s1 + $0x90] sm:$0xf]  ;;  %v1163_v12 = vld [vmem:[%s1730_s1 + $0x94] sm:$0xf0]  ;;  %v1014_v16 = vld [vmem:[%s1730_s1 + $0x98] sm:$0xf0]  ;;  %v949_v19 = vor.u32 %v1147_v10, %v948_v9 }
  0x13   :  { %v1144_v17 = vld [vmem:[%s1730_s1 + $0x4] sm:$0xf]  ;;  %v942_v20 = vld [vmem:[%s1730_s1 + $0x8] sm:$0xf0]  ;;  %v940_v21 = vld [vmem:[%s1730_s1] sm:$0xf] }
  0x14   :  { %317 = vmatpush.bf16.msra.mxu1 %v1037_v51  ;;  %383 = vmatpush.bf16.msra.mxu3 %v1041_v52  ;;  %v1145_v22 = vld [vmem:[%s1730_s1 + $0x4] sm:$0xf0] }
  0x15   :  { %351 = vmatpush.bf16.msra.mxu2 %v969_v55  ;;  %285 = vmatpush.bf16.msra.mxu0 %v965_v56 }
  0x18   :  { %318 = vmatpush.bf16.msra.mxu1 %v1029_v63  ;;  %384 = vmatpush.bf16.msra.mxu3 %v1033_v0 }
  0x19   :  { %352 = vmatpush.bf16.msra.mxu2 %v961_v3  ;;  %286 = vmatpush.bf16.msra.mxu0 %v957_v4 }
  0x1a   :  { %10 = vsyncpa [#allocation3], 0  ;;  %v1013_v23 = vor.u32 %v1163_v12, %v1012_v11  ;;  %v1017_v24 = vor.u32 %v1162_v15, %v1014_v16  ;;  %v1004_v25 = vld [vmem:[%s1730_s1 + $0x80] sm:$0xf]  ;;  %v945_v26 = vor.u32 %v1144_v17, %v942_v20  ;;  %v941_v27 = vor.u32 %v1145_v22, %v940_v21  ;;  %v1161_v28 = vld [vmem:[%s1730_s1 + $0x84] sm:$0xf0] }
  0x1b   :  { %v908_v29 = vld [vmem:[%s1729_s0] sm:$0xf]  ;;  %v1137_v30 = vld [vmem:[%s1729_s0 + $0x4] sm:$0xf0]  ;;  %v1160_v31 = vld [vmem:[%s1730_s1 + $0x84] sm:$0xf]  ;;  %v1005_v33 = vor.u32 %v1161_v28, %v1004_v25 }
  0x1c   :  { %319 = vmatpush.bf16.msra.mxu1 %v1021_v13  ;;  %385 = vmatpush.bf16.msra.mxu3 %v1025_v14  ;;  %v1006_v32 = vld [vmem:[%s1730_s1 + $0x88] sm:$0xf0]  ;;  %v909_v34 = vor.u32 %v1137_v30, %v908_v29  ;;  %v1136_v35 = vld [vmem:[%s1729_s0 + $0x4] sm:$0xf]  ;;  %vm258_vm1 = vcmask 949248   ;;  %v446_v51 = vld [vmem:[%s1731_s2 + $0x78] sm:$0xff] }
  0x1d   :  { %353 = vmatpush.bf16.msra.mxu2 %v953_v18  ;;  %287 = vmatpush.bf16.msra.mxu0 %v949_v19  ;;  %v910_v36 = vld [vmem:[%s1729_s0 + $0x8] sm:$0xf0]  ;;  %v1009_v37 = vor.u32 %v1160_v31, %v1006_v32  ;;  %v916_v39 = vld [vmem:[%s1729_s0 + $0x10] sm:$0xf]  ;;  %v1139_v40 = vld [vmem:[%s1729_s0 + $0x14] sm:$0xf0] }
  0x1e   :  { %v913_v38 = vor.u32 %v1136_v35, %v910_v36  ;;  %v917_v41 = vor.u32 %v1139_v40, %v916_v39  ;;  %v1138_v42 = vld [vmem:[%s1729_s0 + $0x14] sm:$0xf]  ;;  %v918_v43 = vld [vmem:[%s1729_s0 + $0x18] sm:$0xf0]  ;;  %v924_v45 = vld [vmem:[%s1729_s0 + $0x20] sm:$0xf] }
  0x1f   :  { %v921_v44 = vor.u32 %v1138_v42, %v918_v43  ;;  %v1141_v46 = vld [vmem:[%s1729_s0 + $0x24] sm:$0xf0]  ;;  %v1140_v48 = vld [vmem:[%s1729_s0 + $0x24] sm:$0xf]  ;;  %v926_v49 = vld [vmem:[%s1729_s0 + $0x28] sm:$0xf0] }
  0x20   :  { %320 = vmatpush.bf16.msra.mxu1 %v1013_v23  ;;  %386 = vmatpush.bf16.msra.mxu3 %v1017_v24  ;;  %v925_v47 = vor.u32 %v1141_v46, %v924_v45  ;;  %v929_v50 = vor.u32 %v1140_v48, %v926_v49  ;;  %v449_v52 = vld [vmem:[%s1731_s2 + $0x90] sm:$0x1]  ;;  %vm478_vm2 = vcmask 1040384   ;;  %v444_v54 = vld [vmem:[%s1731_s2 + $0x68] sm:$0xff]  ;;  %v443_v56 = vld [vmem:[%s1731_s2 + $0x60] sm:$0xff]  ;;  %vm450_vm3 = vcmask 138240  }
  0x21   :  { %354 = vmatpush.bf16.msra.mxu2 %v945_v26  ;;  %288 = vmatpush.bf16.msra.mxu0 %v941_v27  ;;  %v445_v53 = vld [vmem:[%s1731_s2 + $0x70] sm:$0xff]  ;;  %v448_v55 = vld [vmem:[%s1731_s2 + $0x88] sm:$0xff]  ;;  %v447_v57 = vld [vmem:[%s1731_s2 + $0x80] sm:$0xff]  ;;  %vm590_vm4 = vcmask 269312   ;;  %s1222_s16 = smov [#allocation2]   ;;  %s897_s20 = sshll.u32 %s1734_s5, 4  ;;  %s898_s20 = int_to_ptr.hbm [resolvable:$true] %s897_s20 }
  0x22   :  { %v932_v58 = vld [vmem:[%s1729_s0 + $0x30] sm:$0xf]  ;;  %v1143_v59 = vld [vmem:[%s1729_s0 + $0x34] sm:$0xf0]  ;;  %v1142_v62 = vld [vmem:[%s1729_s0 + $0x34] sm:$0xf] }
  0x23   :  { %v442_v60 = vld [vmem:[%s1731_s2 + $0x58] sm:$0xff]  ;;  %v933_v61 = vor.u32 %v1143_v59, %v932_v58  ;;  %v441_v0 = vld [vmem:[%s1731_s2 + $0x50] sm:$0xff]  ;;  %v440_v2 = vld [vmem:[%s1731_s2 + $0x48] sm:$0xff]  ;;  %s895_s17 = sshll.u32 %s1222_s16, 4  ;;  %vm888_vm5 = vcmask 57344   ;;  %s896_s17 = int_to_ptr.vmem [resolvable:$true] %s895_s17 }
  0x24   :  { %321 = vmatpush.bf16.msra.mxu1 %v1005_v33  ;;  %355 = vmatmul.bf16.vlgmr.msra.gmra.mxu2 %v909_v34  ;;  %v934_v63 = vld [vmem:[%s1729_s0 + $0x38] sm:$0xf0]  ;;  %v439_v3 = vld [vmem:[%s1731_s2 + $0x40] sm:$0xff]  ;;  %v437_v6 = vld [vmem:[%s1731_s2 + $0x30] sm:$0xff] }
  0x25   :  { %387 = vmatpush.bf16.msra.mxu3 %v1009_v37  ;;  %289 = vmatmul.bf16.vlgmr.msra.gmra.mxu0 %v909_v34  ;;  %v937_v1 = vor.u32 %v1142_v62, %v934_v63  ;;  %v438_v4 = vld [vmem:[%s1731_s2 + $0x38] sm:$0xff]  ;;  %v29_v5 = vld [vmem:[%s1729_s0 + $0x40] sm:$0xff]  ;;  %v436_v7 = vld [vmem:[%s1731_s2 + $0x28] sm:$0xff] }
  0x26   :  { %482 = vmatpush.msrb.mxu0 %v446_v51  ;;  %1190 = vmatpush.msk.msrb.mxu2 %vm478_vm2, %v449_v52  ;;  %v86_v8 = vunpack.c.l.b16 %v29_v5  ;;  %v435_v9 = vld [vmem:[%s1731_s2 + $0x20] sm:$0xff]  ;;  %v87_v10 = vunpack.c.h.b16 %v29_v5  ;;  %v434_v13 = vld [vmem:[%s1731_s2 + $0x18] sm:$0xff]  ;;  %v433_v14 = vld [vmem:[%s1731_s2 + $0x10] sm:$0xff] }
  0x27   :  { %1058 = vmatmul.msk.bf16.vlgmr.msra.gmra.mxu1 %vm258_vm1, %v913_v38  ;;  %v432_v15 = vld [vmem:[%s1731_s2 + $0x8] sm:$0xff]  ;;  %v431_v16 = vld [vmem:[%s1731_s2] sm:$0xff] }
  0x28   :  { %1063 = vmatmul.msk.bf16.vlgmr.msra.gmra.mxu3 %vm258_vm1, %v913_v38  ;;  %1068 = vmatpush.msk.msrb.mxu1 %vm478_vm2, %v449_v52  ;;  %v96_v11 = vpack.c.b16 %v86_v8, %v86_v8  ;;  %v97_v12 = vpack.c.b16 %v87_v10, %v87_v10 }
  0x29   :  { %1174 = vmatpush.msrb.mxu3 %v446_v51  ;;  %483 = vmatpush.msrb.mxu0 %v445_v53 }
  0x2a   :  { %540 = vmatpush.msrb.mxu1 %v448_v55  ;;  %1191 = vmatpush.msrb.mxu2 %v448_v55 }
  0x2b   :  { %1175 = vmatpush.msrb.mxu3 %v445_v53  ;;  %484 = vmatpush.msrb.mxu0 %v444_v54 }
  0x2c   :  { %541 = vmatpush.msrb.mxu1 %v447_v57  ;;  %1192 = vmatpush.msrb.mxu2 %v447_v57 }
  0x2d   :  { %1176 = vmatpush.msrb.mxu3 %v444_v54  ;;  %485 = vmatpush.msrb.mxu0 %v443_v56 }
  0x2f   :  { %1177 = vmatpush.msrb.mxu3 %v443_v56  ;;  %486 = vmatpush.msrb.mxu0 %v442_v60 }
  0x31   :  { %1178 = vmatpush.msrb.mxu3 %v442_v60  ;;  %487 = vmatpush.msrb.mxu0 %v441_v0 }
  0x33   :  { %1179 = vmatpush.msrb.mxu3 %v441_v0  ;;  %488 = vmatpush.msrb.mxu0 %v440_v2 }
  0x34   :  { %360 = vmatmul.bf16.gmra.mxu2 %v917_v41 }
  0x35   :  { %294 = vmatmul.bf16.gmra.mxu0 %v917_v41  ;;  %1180 = vmatpush.msrb.mxu3 %v440_v2 }
  0x36   :  { %489 = vmatpush.msrb.mxu0 %v439_v3 }
  0x37   :  { %1059 = vmatmul.msk.bf16.gmra.mxu1 %vm258_vm1, %v921_v44  ;;  %1181 = vmatpush.msrb.mxu3 %v439_v3 }
  0x38   :  { %1064 = vmatmul.msk.bf16.gmra.mxu3 %vm258_vm1, %v921_v44  ;;  %490 = vmatpush.msrb.mxu0 %v438_v4 }
  0x39   :  { %1182 = vmatpush.msrb.mxu3 %v438_v4 }
  0x3a   :  { %491 = vmatpush.msrb.mxu0 %v437_v6 }
  0x3b   :  { %1183 = vmatpush.msrb.mxu3 %v437_v6 }
  0x3c   :  { %492 = vmatpush.msrb.mxu0 %v436_v7 }
  0x3d   :  { %1184 = vmatpush.msrb.mxu3 %v436_v7 }
  0x3e   :  { %493 = vmatpush.msrb.mxu0 %v435_v9 }
  0x3f   :  { %1185 = vmatpush.msrb.mxu3 %v435_v9 }
  0x40   :  { %494 = vmatpush.msrb.mxu0 %v434_v13 }
  0x41   :  { %1186 = vmatpush.msrb.mxu3 %v434_v13 }
  0x42   :  { %495 = vmatpush.msrb.mxu0 %v433_v14 }
  0x43   :  { %1187 = vmatpush.msrb.mxu3 %v433_v14 }
  0x44   :  { %365 = vmatmul.bf16.gmra.mxu2 %v925_v47  ;;  %496 = vmatpush.msrb.mxu0 %v432_v15 }
  0x45   :  { %299 = vmatmul.bf16.gmra.mxu0 %v925_v47  ;;  %1188 = vmatpush.msrb.mxu3 %v432_v15 }
  0x46   :  { %497 = vmatpush.msrb.mxu0 %v431_v16 }
  0x47   :  { %1060 = vmatmul.msk.bf16.gmra.mxu1 %vm258_vm1, %v929_v50  ;;  %1189 = vmatpush.msrb.mxu3 %v431_v16 }
  0x48   :  { %1065 = vmatmul.msk.bf16.gmra.mxu3 %vm258_vm1, %v929_v50 }
  0x54   :  { %370 = vmatmul.bf16.gmra.mxu2 %v933_v61 }
  0x55   :  { %304 = vmatmul.bf16.gmra.mxu0 %v933_v61 }
  0x57   :  { %1061 = vmatmul.msk.bf16.gmra.mxu1 %vm258_vm1, %v937_v1 }
  0x58   :  { %1066 = vmatmul.msk.bf16.gmra.mxu3 %vm258_vm1, %v937_v1 }
  0x64   :  { %375 = vmatmul.bf16.gmra.mxu2 %v96_v11 }
  0x65   :  { %309 = vmatmul.bf16.gmra.mxu0 %v96_v11 }
  0x67   :  { %1062 = vmatmul.msk.bf16.gmra.mxu1 %vm258_vm1, %v97_v12 }
  0x68   :  { %1067 = vmatmul.msk.bf16.gmra.mxu3 %vm258_vm1, %v97_v12 }
  0xa2   :  { %v290_v17 = vpop.f32.mrf.mxu0 }
  0xa4   :  { %v323_v18 = vpop.f32.mrf.mxu1 }
  0xa5   :  { %v324_v19 = vadd.f32 %v323_v18, %v290_v17 }
  0xa7   :  { %v413_v20 = vmax.f32 %v324_v19, 0.0  ;;  %v356_v21 = vpop.f32.mrf.mxu2 }
  0xa9   :  { %498 = vmatmul.f32.vlgmr.msrb.gmra.mxu0 %v413_v20 }
  0xaa   :  { %v292_v22 = vpop.f32.mrf.mxu0 }
  0xab   :  { %v389_v23 = vpop.f32.mrf.mxu3 }
  0xac   :  { %v390_v24 = vadd.f32 %v389_v23, %v356_v21  ;;  %v325_v25 = vpop.f32.mrf.mxu1 }
  0xad   :  { %v326_v26 = vadd.f32 %v325_v25, %v292_v22 }
  0xae   :  { %v414_v27 = vmax.f32 %v390_v24, 0.0 }
  0xaf   :  { %v415_v28 = vmax.f32 %v326_v26, 0.0  ;;  %v358_v29 = vpop.f32.mrf.mxu2 }
  0xb0   :  { %1069 = vmatmul.msk.f32.vlgmr.msrb.gmra.mxu1 %vm450_vm3, %v414_v27 }
  0xb1   :  { %501 = vmatmul.f32.gmra.mxu0 %v415_v28 }
  0xb2   :  { %v295_v30 = vpop.f32.mrf.mxu0 }
  0xb3   :  { %v391_v31 = vpop.f32.mrf.mxu3 }
  0xb4   :  { %v392_v32 = vadd.f32 %v391_v31, %v358_v29  ;;  %v328_v33 = vpop.f32.mrf.mxu1  ;;  %v583_v29 = vld [vmem:[%s1732_s3 + $0x20] sm:$0x1]  ;;  %v581_v31 = vld [vmem:[%s1732_s3 + $0x10] sm:$0xff] }
  0xb5   :  { %v329_v34 = vadd.f32 %v328_v33, %v295_v30  ;;  %v582_v30 = vld [vmem:[%s1732_s3 + $0x18] sm:$0xff]  ;;  %1085 = vmatpush.msk.msra.mxu3 %vm478_vm2, %v583_v29  ;;  %v1082_v33 = vld [vmem:[%s1732_s3 + $0x48] sm:$0x1] }
  0xb6   :  { %v416_v35 = vmax.f32 %v392_v32, 0.0  ;;  %v580_v32 = vld [vmem:[%s1732_s3 + $0x8] sm:$0xff]  ;;  %1083 = vmatpush.msk.msra.mxu2 %vm478_vm2, %v1082_v33  ;;  %v1129_v33 = vld [vmem:[%s1732_s3 + $0x140] sm:$0xff] }
  0xb7   :  { %v417_v36 = vmax.f32 %v329_v34, 0.0  ;;  %v361_v37 = vpop.f32.mrf.mxu2  ;;  %635 = vmatpush.msra.mxu3 %v582_v30  ;;  %v579_v34 = vld [vmem:[%s1732_s3] sm:$0xff] }
  0xb8   :  { %1070 = vmatmul.msk.f32.gmra.mxu1 %vm450_vm3, %v416_v35  ;;  %v1081_v35 = vld [vmem:[%s1732_s3 + $0x40] sm:$0xff] }
  0xb9   :  { %504 = vmatmul.f32.gmra.mxu0 %v417_v36  ;;  %636 = vmatpush.msra.mxu3 %v581_v31  ;;  %v1080_v36 = vld [vmem:[%s1732_s3 + $0x38] sm:$0xff]  ;;  %v1130_v31 = vld [vmem:[%s1732_s3 + $0x148] sm:$0xff] }
  0xba   :  { %v297_v38 = vpop.f32.mrf.mxu0  ;;  %609 = vmatpush.msra.mxu2 %v1081_v35 }
  0xbb   :  { %v394_v39 = vpop.f32.mrf.mxu3  ;;  %637 = vmatpush.msra.mxu3 %v580_v32 }
  0xbc   :  { %v395_v40 = vadd.f32 %v394_v39, %v361_v37  ;;  %v330_v41 = vpop.f32.mrf.mxu1  ;;  %610 = vmatpush.msra.mxu2 %v1080_v36  ;;  %v1079_v37 = vld [vmem:[%s1732_s3 + $0x30] sm:$0xff] }
  0xbd   :  { %v331_v42 = vadd.f32 %v330_v41, %v297_v38  ;;  %638 = vmatpush.msra.mxu3 %v579_v34  ;;  %v1078_v38 = vld [vmem:[%s1732_s3 + $0x28] sm:$0xff]  ;;  %v1091_v39 = vld [vmem:[%s1732_s3 + $0x70] sm:$0x1]  ;;  %v1089_v41 = vld [vmem:[%s1732_s3 + $0x60] sm:$0xff] }
  0xbe   :  { %v418_v43 = vmax.f32 %v395_v40, 0.0  ;;  %611 = vmatpush.msra.mxu2 %v1079_v37  ;;  %v1090_v40 = vld [vmem:[%s1732_s3 + $0x68] sm:$0xff] }
  0xbf   :  { %v419_v44 = vmax.f32 %v331_v42, 0.0  ;;  %v363_v45 = vpop.f32.mrf.mxu2  ;;  %v1088_v42 = vld [vmem:[%s1732_s3 + $0x58] sm:$0xff] }
  0xc0   :  { %1071 = vmatmul.msk.f32.gmra.mxu1 %vm450_vm3, %v418_v43  ;;  %612 = vmatpush.msra.mxu2 %v1078_v38  ;;  %v1087_v43 = vld [vmem:[%s1732_s3 + $0x50] sm:$0xff] }
  0xc1   :  { %507 = vmatmul.f32.gmra.mxu0 %v419_v44  ;;  %v1098_v44 = vld [vmem:[%s1732_s3 + $0x98] sm:$0x1] }
  0xc2   :  { %v300_v46 = vpop.f32.mrf.mxu0 }
  0xc3   :  { %v396_v47 = vpop.f32.mrf.mxu3 }
  0xc4   :  { %v397_v48 = vadd.f32 %v396_v47, %v363_v45  ;;  %v333_v49 = vpop.f32.mrf.mxu1  ;;  %v1097_v45 = vld [vmem:[%s1732_s3 + $0x90] sm:$0xff] }
  0xc5   :  { %v334_v50 = vadd.f32 %v333_v49, %v300_v46  ;;  %v1096_v46 = vld [vmem:[%s1732_s3 + $0x88] sm:$0xff]  ;;  %v1094_v49 = vld [vmem:[%s1732_s3 + $0x78] sm:$0xff] }
  0xc6   :  { %v420_v51 = vmax.f32 %v397_v48, 0.0  ;;  %v1095_v48 = vld [vmem:[%s1732_s3 + $0x80] sm:$0xff] }
  0xc7   :  { %v421_v52 = vmax.f32 %v334_v50, 0.0  ;;  %v366_v53 = vpop.f32.mrf.mxu2 }
  0xc8   :  { %1072 = vmatmul.msk.f32.gmra.mxu1 %vm450_vm3, %v420_v51 }
  0xc9   :  { %510 = vmatmul.f32.gmra.mxu0 %v421_v52 }
  0xca   :  { %v302_v54 = vpop.f32.mrf.mxu0 }
  0xcb   :  { %v399_v55 = vpop.f32.mrf.mxu3 }
  0xcc   :  { %v400_v56 = vadd.f32 %v399_v55, %v366_v53  ;;  %v335_v57 = vpop.f32.mrf.mxu1  ;;  %v1111_v55 = vld [vmem:[%s1732_s3 + $0xe0] sm:$0xff] }
  0xcd   :  { %v336_v58 = vadd.f32 %v335_v57, %v302_v54  ;;  %v1112_v54 = vld [vmem:[%s1732_s3 + $0xe8] sm:$0x1] }
  0xce   :  { %v422_v59 = vmax.f32 %v400_v56, 0.0  ;;  %v1110_v56 = vld [vmem:[%s1732_s3 + $0xd8] sm:$0xff] }
  0xcf   :  { %v423_v60 = vmax.f32 %v336_v58, 0.0  ;;  %v368_v61 = vpop.f32.mrf.mxu2 }
  0xd0   :  { %1073 = vmatmul.msk.f32.gmra.mxu1 %vm450_vm3, %v422_v59 }
  0xd1   :  { %513 = vmatmul.f32.gmra.mxu0 %v423_v60  ;;  %v1109_v60 = vld [vmem:[%s1732_s3 + $0xd0] sm:$0xff] }
  0xd2   :  { %v305_v62 = vpop.f32.mrf.mxu0 }
  0xd3   :  { %v401_v63 = vpop.f32.mrf.mxu3 }
  0xd4   :  { %v402_v0 = vadd.f32 %v401_v63, %v368_v61  ;;  %v338_v1 = vpop.f32.mrf.mxu1  ;;  %v1108_v63 = vld [vmem:[%s1732_s3 + $0xc8] sm:$0xff] }
  0xd5   :  { %v339_v2 = vadd.f32 %v338_v1, %v305_v62  ;;  %v1105_v62 = vld [vmem:[%s1732_s3 + $0xc0] sm:$0x1]  ;;  %v1103_v1 = vld [vmem:[%s1732_s3 + $0xb0] sm:$0xff] }
  0xd6   :  { %v424_v3 = vmax.f32 %v402_v0, 0.0  ;;  %v1104_v0 = vld [vmem:[%s1732_s3 + $0xb8] sm:$0xff] }
  0xd7   :  { %v425_v4 = vmax.f32 %v339_v2, 0.0  ;;  %v371_v5 = vpop.f32.mrf.mxu2 }
  0xd8   :  { %1074 = vmatmul.msk.f32.gmra.mxu1 %vm450_vm3, %v424_v3 }
  0xd9   :  { %516 = vmatmul.f32.gmra.mxu0 %v425_v4 }
  0xda   :  { %v307_v6 = vpop.f32.mrf.mxu0 }
  0xdb   :  { %v404_v7 = vpop.f32.mrf.mxu3 }
  0xdc   :  { %v405_v8 = vadd.f32 %v404_v7, %v371_v5  ;;  %v340_v9 = vpop.f32.mrf.mxu1  ;;  %v1102_v5 = vld [vmem:[%s1732_s3 + $0xa8] sm:$0xff]  ;;  %v1101_v7 = vld [vmem:[%s1732_s3 + $0xa0] sm:$0xff] }
  0xdd   :  { %v341_v10 = vadd.f32 %v340_v9, %v307_v6  ;;  %v1118_v9 = vld [vmem:[%s1732_s3 + $0x108] sm:$0xff] }
  0xde   :  { %v426_v11 = vmax.f32 %v405_v8, 0.0  ;;  %v1119_v8 = vld [vmem:[%s1732_s3 + $0x110] sm:$0x1] }
  0xdf   :  { %v427_v12 = vmax.f32 %v341_v10, 0.0  ;;  %v373_v13 = vpop.f32.mrf.mxu2 }
  0xe0   :  { %1075 = vmatmul.msk.f32.gmra.mxu1 %vm450_vm3, %v426_v11  ;;  %v1117_v11 = vld [vmem:[%s1732_s3 + $0x100] sm:$0xff] }
  0xe1   :  { %519 = vmatmul.f32.gmra.mxu0 %v427_v12 }
  0xe2   :  { %v310_v14 = vpop.f32.mrf.mxu0 }
  0xe3   :  { %v406_v15 = vpop.f32.mrf.mxu3 }
  0xe4   :  { %v407_v16 = vadd.f32 %v406_v15, %v373_v13  ;;  %v343_v17 = vpop.f32.mrf.mxu1 }
  0xe5   :  { %v344_v18 = vadd.f32 %v343_v17, %v310_v14  ;;  %v1116_v14 = vld [vmem:[%s1732_s3 + $0xf8] sm:$0xff]  ;;  %v1115_v17 = vld [vmem:[%s1732_s3 + $0xf0] sm:$0xff] }
  0xe6   :  { %v428_v19 = vmax.f32 %v407_v16, 0.0  ;;  %v1126_v16 = vld [vmem:[%s1732_s3 + $0x138] sm:$0x1] }
  0xe7   :  { %v429_v20 = vmax.f32 %v344_v18, 0.0  ;;  %v376_v21 = vpop.f32.mrf.mxu2  ;;  %v1125_v18 = vld [vmem:[%s1732_s3 + $0x130] sm:$0xff] }
  0xe8   :  { %1076 = vmatmul.msk.f32.gmra.mxu1 %vm450_vm3, %v428_v19  ;;  %v1124_v19 = vld [vmem:[%s1732_s3 + $0x128] sm:$0xff] }
  0xe9   :  { %522 = vmatmul.f32.vlgmr.msrb.gmra.mxu3 %v429_v20 }
  0xea   :  { %v312_v22 = vpop.f32.mrf.mxu0  ;;  %1099 = vmatpush.msk.msrb.mxu3 %vm478_vm2, %v1098_v44 }
  0xeb   :  { %v409_v23 = vpop.f32.mrf.mxu3  ;;  %v1123_v22 = vld [vmem:[%s1732_s3 + $0x120] sm:$0xff] }
  0xec   :  { %v410_v24 = vadd.f32 %v409_v23, %v376_v21  ;;  %v345_v25 = vpop.f32.mrf.mxu1  ;;  %700 = vmatpush.msrb.mxu3 %v1097_v45 }
  0xed   :  { %v1133_v25 = vld [vmem:[%s1732_s3 + $0x160] sm:$0x1] }
  0xee   :  { %v430_v26 = vmax.f32 %v410_v24, 0.0  ;;  %701 = vmatpush.msrb.mxu3 %v1096_v46  ;;  %v1122_v24 = vld [vmem:[%s1732_s3 + $0x118] sm:$0xff] }
  0xef   :  { %v378_v27 = vpop.f32.mrf.mxu2 }
  0xf0   :  { %1077 = vmatmul.msk.f32.vlgmr.msrb.gmra.mxu2 %vm450_vm3, %v430_v26  ;;  %702 = vmatpush.msrb.mxu3 %v1095_v48  ;;  %v1132_v27 = vld [vmem:[%s1732_s3 + $0x158] sm:$0xff] }
  0xf1   :  { %1092 = vmatpush.msk.msrb.mxu2 %vm478_vm2, %v1091_v39 }
  0xf2   :  { %703 = vmatpush.msrb.mxu3 %v1094_v49 }
  0xf3   :  { %v411_v28 = vpop.f32.mrf.mxu3  ;;  %667 = vmatpush.msrb.mxu2 %v1090_v40 }
  0xf4   :  { %v1131_v28 = vld [vmem:[%s1732_s3 + $0x150] sm:$0xff] }
  0xf5   :  { %668 = vmatpush.msrb.mxu2 %v1089_v41 }
  0xf7   :  { %669 = vmatpush.msrb.mxu2 %v1088_v42 }
  0xf9   :  { %670 = vmatpush.msrb.mxu2 %v1087_v43 }
 0x126   :  { %v499_v47 = vpop.f32.mrf.mxu0 }
 0x12d   :  { %v543_v50 = vpop.f32.mrf.mxu1 }
 0x12e   :  { %v544_v51 = vadd.f32 %v543_v50, %v499_v47  ;;  %v502_v52 = vpop.f32.mrf.mxu0 }
 0x130   :  { %v570_v53 = vmax.f32 %v544_v51, 0.0 }
 0x132   :  { %1086 = vmatmul.msk.f32.vlgmr.msra.gmra.mxu3 %vm590_vm4, %v570_v53 }
 0x133   :  { %1113 = vmatpush.msk.msra.mxu3 %vm478_vm2, %v1112_v54 }
 0x135   :  { %v546_v57 = vpop.f32.mrf.mxu1  ;;  %766 = vmatpush.msra.mxu3 %v1111_v55 }
 0x136   :  { %v547_v58 = vadd.f32 %v546_v57, %v502_v52  ;;  %v505_v59 = vpop.f32.mrf.mxu0 }
 0x137   :  { %767 = vmatpush.msra.mxu3 %v1110_v56 }
 0x138   :  { %v571_v61 = vmax.f32 %v547_v58, 0.0 }
 0x139   :  { %768 = vmatpush.msra.mxu3 %v1109_v60 }
 0x13a   :  { %1084 = vmatmul.msk.f32.vlgmr.msra.gmra.mxu2 %vm590_vm4, %v571_v61 }
 0x13b   :  { %1106 = vmatpush.msk.msra.mxu2 %vm478_vm2, %v1105_v62  ;;  %769 = vmatpush.msra.mxu3 %v1108_v63  ;;  %v1194_v63 = vld [vmem:[%s1733_s4] ss:$0 sm:$0xff] }
 0x13d   :  { %v549_v2 = vpop.f32.mrf.mxu1  ;;  %733 = vmatpush.msra.mxu2 %v1104_v0 }
 0x13e   :  { %v550_v3 = vadd.f32 %v549_v2, %v505_v59  ;;  %v508_v4 = vpop.f32.mrf.mxu0 }
 0x13f   :  { %734 = vmatpush.msra.mxu2 %v1103_v1  ;;  %v1195_v1 = vld [vmem:[%s1733_s4 + $0x1] ss:$0 sm:$0xff] }
 0x140   :  { %v572_v6 = vmax.f32 %v550_v3, 0.0 }
 0x141   :  { %735 = vmatpush.msra.mxu2 %v1102_v5 }
 0x142   :  { %1093 = vmatmul.msk.f32.vlgmr.msrb.gmra.mxu2 %vm590_vm4, %v572_v6 }
 0x143   :  { %736 = vmatpush.msra.mxu2 %v1101_v7 }
 0x145   :  { %1120 = vmatpush.msk.msrb.mxu2 %vm478_vm2, %v1119_v8  ;;  %v552_v10 = vpop.f32.mrf.mxu1 }
 0x146   :  { %v553_v12 = vadd.f32 %v552_v10, %v508_v4  ;;  %v511_v13 = vpop.f32.mrf.mxu0  ;;  %v884_v4 = vlaneseq }
 0x147   :  { %799 = vmatpush.msrb.mxu2 %v1118_v9 }
 0x148   :  { %v573_v15 = vmax.f32 %v553_v12, 0.0  ;;  %v885_v5 = vand.u32 127, %v884_v4 }
 0x149   :  { %800 = vmatpush.msrb.mxu2 %v1117_v11 }
 0x14a   :  { %1100 = vmatmul.msk.f32.vlgmr.msrb.gmra.mxu3 %vm590_vm4, %v573_v15 }
 0x14b   :  { %801 = vmatpush.msrb.mxu2 %v1116_v14  ;;  %1127 = vmatpush.msk.msrb.mxu3 %vm478_vm2, %v1126_v16 }
 0x14d   :  { %802 = vmatpush.msrb.mxu2 %v1115_v17  ;;  %v555_v20 = vpop.f32.mrf.mxu1  ;;  %832 = vmatpush.msrb.mxu3 %v1125_v18 }
 0x14e   :  { %v556_v21 = vadd.f32 %v555_v20, %v511_v13  ;;  %v514_v26 = vpop.f32.mrf.mxu0 }
 0x14f   :  { %833 = vmatpush.msrb.mxu3 %v1124_v19 }
 0x150   :  { %v574_v23 = vmax.f32 %v556_v21, 0.0 }
 0x151   :  { %834 = vmatpush.msrb.mxu3 %v1123_v22 }
 0x152   :  { %1107 = vmatmul.msk.f32.vlgmr.msra.gmra.mxu2 %vm590_vm4, %v574_v23 }
 0x153   :  { %835 = vmatpush.msrb.mxu3 %v1122_v24  ;;  %1134 = vmatpush.msk.msra.mxu2 %vm478_vm2, %v1133_v25 }
 0x155   :  { %v558_v29 = vpop.f32.mrf.mxu1  ;;  %865 = vmatpush.msra.mxu2 %v1132_v27 }
 0x156   :  { %v559_v30 = vadd.f32 %v558_v29, %v514_v26  ;;  %v517_v34 = vpop.f32.mrf.mxu0 }
 0x157   :  { %866 = vmatpush.msra.mxu2 %v1131_v28 }
 0x158   :  { %v575_v32 = vmax.f32 %v559_v30, 0.0 }
 0x159   :  { %867 = vmatpush.msra.mxu2 %v1130_v31 }
 0x15a   :  { %1114 = vmatmul.msk.f32.vlgmr.msra.gmra.mxu3 %vm590_vm4, %v575_v32 }
 0x15b   :  { %868 = vmatpush.msra.mxu2 %v1129_v33 }
 0x15d   :  { %v561_v35 = vpop.f32.mrf.mxu1 }
 0x15e   :  { %v562_v36 = vadd.f32 %v561_v35, %v517_v34  ;;  %v520_v38 = vpop.f32.mrf.mxu0 }
 0x160   :  { %v576_v37 = vmax.f32 %v562_v36, 0.0 }
 0x162   :  { %1121 = vmatmul.msk.f32.vlgmr.msrb.gmra.mxu2 %vm590_vm4, %v576_v37 }
 0x165   :  { %v564_v39 = vpop.f32.mrf.mxu1 }
 0x166   :  { %v565_v40 = vadd.f32 %v564_v39, %v520_v38 }
 0x168   :  { %v577_v41 = vmax.f32 %v565_v40, 0.0 }
 0x16a   :  { %1128 = vmatmul.msk.f32.vlgmr.msrb.gmra.mxu3 %vm590_vm4, %v577_v41 }
 0x16c   :  { %v523_v42 = vpop.f32.mrf.mxu3 }
 0x173   :  { %v567_v43 = vpop.f32.mrf.mxu2 }
 0x174   :  { %v568_v44 = vadd.f32 %v567_v43, %v523_v42 }
 0x176   :  { %v578_v45 = vmax.f32 %v568_v44, 0.0 }
 0x178   :  { %1135 = vmatmul.msk.f32.vlgmr.msra.gmra.mxu2 %vm590_vm4, %v578_v45 }
 0x1b5   :  { %v640_v47 = vpop.f32.mrf.mxu3 }
 0x1bd   :  { %v614_v46 = vpop.f32.mrf.mxu2 }
 0x1be   :  { %v641_v51 = vadd.f32 %v640_v47, %v614_v46 }
 0x1c5   :  { %v672_v48 = vpop.f32.mrf.mxu2 }
 0x1c6   :  { %v675_v53 = vadd.f32 %v672_v48, %v641_v51 }
 0x1cd   :  { %v705_v49 = vpop.f32.mrf.mxu3 }
 0x1ce   :  { %v708_v54 = vadd.f32 %v705_v49, %v675_v53 }
 0x1d5   :  { %v738_v50 = vpop.f32.mrf.mxu2 }
 0x1d6   :  { %v741_v56 = vadd.f32 %v738_v50, %v708_v54 }
 0x1dd   :  { %v771_v52 = vpop.f32.mrf.mxu3 }
 0x1de   :  { %v774_v57 = vadd.f32 %v771_v52, %v741_v56 }
 0x1e5   :  { %v804_v55 = vpop.f32.mrf.mxu2 }
 0x1e6   :  { %v807_v59 = vadd.f32 %v804_v55, %v774_v57 }
 0x1ed   :  { %v837_v58 = vpop.f32.mrf.mxu3 }
 0x1ee   :  { %v840_v60 = vadd.f32 %v837_v58, %v807_v59 }
 0x1fb   :  { %v870_v61 = vpop.f32.mrf.mxu2 }
 0x1fc   :  { %v873_v62 = vadd.f32 %v870_v61, %v840_v60 }
 0x1fe   :  { %v874_v0 = vmax.f32 %v873_v62, 0.0 }
 0x200   :  { %v877_v2 = vmul.f32 %v1194_v63, %v874_v0 }
 0x202   :  { %v880_v3 = vadd.f32 %v1195_v1, %v877_v2 }
 0x204   :  { %881 = vadd.xlane.f32.xlu0 %v880_v3 }
 0x277   :  { %v882_v6 = vpop.xlane.xlu0 %881 }
 0x278   :  { %v886_v7 = vperm.slane %v882_v6, %v885_v5 }
 0x27a   :  { %889 = vst.msk [vmem:[#allocation2] sm:$0x1] %vm888_vm5, %v886_v7 }
 0x27b   :  { %900 = dma.vmem_to_hbm [thread:$0]  %s896_s17, 16, %s898_s20, [#allocation3]  }
 0x27c   :  { %1220 = dma.done.wait [#allocation3], 16  }
 0x27d   :  { %1221 = vsyncadd [#allocation3], 4294967280 }
 0x27e   :  { %905 = vsyncpa [#allocation3], 1 }

</bundles_post_ra>
